<compile_context>
chip_gen: v7x
topology: tpu7x:2x2x1
jax: 0.10.0
libtpu: 0.0.40
codegen_flags: <defaults>
</compile_context>

<pallas_src>
import jax
import jax.numpy as jnp
from jax.experimental import pallas as pl
from jax.experimental.pallas import tpu as pltpu

DROPOUT_P = 0.7
# keep an element iff bits >= threshold  ->  P(keep) = 1 - p
_DROP_THRESH = int(DROPOUT_P * (1 << 32))

BATCH = 8
NUM_INPUTS = 256
NUM_HIDDENS = 128
NUM_OUTPUTS = 10
OUT_PAD = 128  # lane-dense padded output width (>= NUM_OUTPUTS, multiple of 128)


def _mlp_dropout_kernel(x_ref, bits1_ref, bits2_ref,
                        w1_ref, b1_ref, w2_ref, b2_ref, w3_ref, b3_ref,
                        o_ref):
    thresh = jnp.uint32(_DROP_THRESH)

    # hidden1: linear + relu + dropout (zeroing only; 1/(1-p) folded into W2)
    h1 = jnp.dot(x_ref[...], w1_ref[...], preferred_element_type=jnp.float32)
    h1 = jnp.maximum(h1 + b1_ref[...], 0.0)
    h1 = jnp.where(bits1_ref[...] >= thresh, h1, 0.0)

    # hidden2: linear + relu + dropout (1/(1-p) folded into W3)
    h2 = jnp.dot(h1.astype(w2_ref.dtype), w2_ref[...],
                 preferred_element_type=jnp.float32)
    h2 = jnp.maximum(h2 + b2_ref[...], 0.0)
    h2 = jnp.where(bits2_ref[...] >= thresh, h2, 0.0)

    # output layer (lane-dense: OUT_PAD columns, extra columns are zero)
    y = jnp.dot(h2.astype(w3_ref.dtype), w3_ref[...],
                preferred_element_type=jnp.float32)
    o_ref[...] = (y + b3_ref[...]).astype(o_ref.dtype)


def _mlp_eval_kernel(x_ref, w1_ref, b1_ref, w2_ref, b2_ref, w3_ref, b3_ref,
                     o_ref):
    h1 = jnp.dot(x_ref[...], w1_ref[...], preferred_element_type=jnp.float32)
    h1 = jnp.maximum(h1 + b1_ref[...], 0.0)
    h2 = jnp.dot(h1.astype(w2_ref.dtype), w2_ref[...],
                 preferred_element_type=jnp.float32)
    h2 = jnp.maximum(h2 + b2_ref[...], 0.0)
    y = jnp.dot(h2.astype(w3_ref.dtype), w3_ref[...],
                preferred_element_type=jnp.float32)
    o_ref[...] = (y + b3_ref[...]).astype(o_ref.dtype)


def classification_forward(x, params, key=None, training=True,
                           compute_dtype=jnp.float32):
    """Forward pass. Weights are stored pre-transposed as (in, out).

    compute_dtype controls the matmul-operand dtype (set jnp.bfloat16 on
    v6e/v7x to halve weight DMA traffic); biases/accum/dropout stay f32.
    """
    w1, b1, w2, b2, w3, b3 = params
    batch = x.shape[0]

    if training:
        inv_keep = 1.0 / (1.0 - DROPOUT_P)
        # fold dropout rescale into downstream weights: (h*s) @ W == h @ (s*W)
        w2 = w2 * inv_keep
        w3 = w3 * inv_keep

    # lane-dense padding of the 10-wide output path
    w3p = jnp.zeros((w3.shape[0], OUT_PAD), jnp.float32).at[:, :NUM_OUTPUTS].set(w3)
    b3p = jnp.zeros((1, OUT_PAD), jnp.float32).at[:, :NUM_OUTPUTS].set(b3)

    xk = x.astype(compute_dtype)
    w1k = w1.astype(compute_dtype)
    w2k = w2.astype(compute_dtype)
    w3k = w3p.astype(compute_dtype)

    # batch tiling: 128-row tiles when possible (fills the MXU); weights stay
    # resident via constant index_maps; grid axis is "parallel" (megacore).
    tile_b = 128 if batch % 128 == 0 else batch
    assert batch % tile_b == 0
    grid = (batch // tile_b,)

    def row_spec(n):
        return pl.BlockSpec((tile_b, n), lambda i: (i, 0))

    def const_spec(r, c):
        return pl.BlockSpec((r, c), lambda i: (0, 0))

    out_spec = pl.BlockSpec((tile_b, OUT_PAD), lambda i: (i, 0))
    out_shape = jax.ShapeDtypeStruct((batch, OUT_PAD), jnp.float32)
    cparams = pltpu.CompilerParams(dimension_semantics=("parallel",))

    weight_specs = [
        const_spec(NUM_INPUTS, NUM_HIDDENS), const_spec(1, NUM_HIDDENS),
        const_spec(NUM_HIDDENS, NUM_HIDDENS), const_spec(1, NUM_HIDDENS),
        const_spec(NUM_HIDDENS, OUT_PAD), const_spec(1, OUT_PAD),
    ]

    if training:
        if key is None:
            key = jax.random.PRNGKey(0)
        k1, k2 = jax.random.split(key)
        bits1 = jax.random.bits(k1, (batch, NUM_HIDDENS), jnp.uint32)
        bits2 = jax.random.bits(k2, (batch, NUM_HIDDENS), jnp.uint32)
        y = pl.pallas_call(
            _mlp_dropout_kernel,
            out_shape=out_shape,
            grid=grid,
            in_specs=[row_spec(NUM_INPUTS),
                      row_spec(NUM_HIDDENS), row_spec(NUM_HIDDENS)] + weight_specs,
            out_specs=out_spec,
            compiler_params=cparams,
        )(xk, bits1, bits2, w1k, b1, w2k, b2, w3k, b3p)
    else:
        y = pl.pallas_call(
            _mlp_eval_kernel,
            out_shape=out_shape,
            grid=grid,
            in_specs=[row_spec(NUM_INPUTS)] + weight_specs,
            out_specs=out_spec,
            compiler_params=cparams,
        )(xk, w1k, b1, w2k, b2, w3k, b3p)

    return y[:, :NUM_OUTPUTS]


def init_params(key):
    """Deterministic init. Weights stored already transposed: (in, out)."""
    k1, k2, k3 = jax.random.split(key, 3)
    w1 = jax.random.normal(k1, (NUM_INPUTS, NUM_HIDDENS), jnp.float32) * 0.01
    b1 = jnp.zeros((1, NUM_HIDDENS), jnp.float32)
    w2 = jax.random.normal(k2, (NUM_HIDDENS, NUM_HIDDENS), jnp.float32) * 0.01
    b2 = jnp.zeros((1, NUM_HIDDENS), jnp.float32)
    w3 = jax.random.normal(k3, (NUM_HIDDENS, NUM_OUTPUTS), jnp.float32) * 0.01
    b3 = jnp.zeros((1, NUM_OUTPUTS), jnp.float32)
    return (w1, b1, w2, b2, w3, b3)


def _eval_reference(x, params):
    w1, b1, w2, b2, w3, b3 = params
    h1 = jnp.maximum(x @ w1 + b1, 0.0)
    h2 = jnp.maximum(h1 @ w2 + b2, 0.0)
    return h2 @ w3 + b3


if __name__ == "__main__":
    key = jax.random.PRNGKey(0)
    kx, kp, kd = jax.random.split(key, 3)
    x = jax.random.normal(kx, (BATCH, NUM_INPUTS), jnp.float32)
    params = init_params(kp)

    # training-mode forward (dropout active), as in the PyTorch module
    out_train = classification_forward(x, params, key=kd, training=True)
    out_train = jax.block_until_ready(out_train)
    assert out_train.shape == (BATCH, NUM_OUTPUTS)
    assert out_train.dtype == jnp.float32
    assert bool(jnp.all(jnp.isfinite(out_train)))

    # eval-mode forward: deterministic, check against pure-JAX reference
    out_eval = classification_forward(x, params, training=False)
    out_eval = jax.block_until_ready(out_eval)
    ref = _eval_reference(x, params)
    assert out_eval.shape == (BATCH, NUM_OUTPUTS)
    assert bool(jnp.allclose(out_eval, ref, atol=1e-4, rtol=1e-4))

    print("KERNEL_OK")
</pallas_src>

<mosaic_0001>
module attributes {stable_mosaic.version = 11 : i64} {
  func.func @_mlp_dropout_kernel(%arg0: i32, %arg1: memref<8x256xf32, #tpu.memory_space<vmem>>, %arg2: memref<8x128xi32, #tpu.memory_space<vmem>>, %arg3: memref<8x128xi32, #tpu.memory_space<vmem>>, %arg4: memref<256x128xf32, #tpu.memory_space<vmem>>, %arg5: memref<1x128xf32, #tpu.memory_space<vmem>>, %arg6: memref<128x128xf32, #tpu.memory_space<vmem>>, %arg7: memref<1x128xf32, #tpu.memory_space<vmem>>, %arg8: memref<128x128xf32, #tpu.memory_space<vmem>>, %arg9: memref<1x128xf32, #tpu.memory_space<vmem>>, %arg10: memref<8x128xf32, #tpu.memory_space<vmem>>) attributes {dimension_semantics = [#tpu.dimension_semantics<parallel>], iteration_bounds = array<i64: 1>, scalar_prefetch = 0 : i64, scratch_operands = 0 : i64, tpu.core_type = #tpu.core_type<tc>, window_params = [{transform_indices = @transform_0, window_bounds = array<i64: 8, 256>}, {transform_indices = @transform_1, window_bounds = array<i64: 8, 128>}, {transform_indices = @transform_2, window_bounds = array<i64: 8, 128>}, {pipeline_mode = #tpu.pipeline_mode<synchronous>, transform_indices = @transform_3, window_bounds = array<i64: 256, 128>}, {pipeline_mode = #tpu.pipeline_mode<synchronous>, transform_indices = @transform_4, window_bounds = array<i64: 1, 128>}, {pipeline_mode = #tpu.pipeline_mode<synchronous>, transform_indices = @transform_5, window_bounds = array<i64: 128, 128>}, {pipeline_mode = #tpu.pipeline_mode<synchronous>, transform_indices = @transform_6, window_bounds = array<i64: 1, 128>}, {pipeline_mode = #tpu.pipeline_mode<synchronous>, transform_indices = @transform_7, window_bounds = array<i64: 128, 128>}, {pipeline_mode = #tpu.pipeline_mode<synchronous>, transform_indices = @transform_8, window_bounds = array<i64: 1, 128>}, {transform_indices = @transform_9, window_bounds = array<i64: 8, 128>}]} {
    %c0 = arith.constant 0 : index
    %c0_0 = arith.constant 0 : index
    %0 = vector.load %arg1[%c0, %c0_0] : memref<8x256xf32, #tpu.memory_space<vmem>>, vector<8x256xf32>
    %c0_1 = arith.constant 0 : index
    %c0_2 = arith.constant 0 : index
    %1 = vector.load %arg4[%c0_1, %c0_2] : memref<256x128xf32, #tpu.memory_space<vmem>>, vector<256x128xf32>
    %cst = arith.constant dense<0.000000e+00> : vector<8x128xf32>
    %2 = tpu.matmul %0, %1, %cst {dimension_numbers = #tpu.dot_dimension_numbers<[1], [0], [0], [1], [0, 0, 1, 1], [], []>} : vector<8x256xf32>, vector<256x128xf32>, vector<8x128xf32> -> vector<8x128xf32>
    %c0_3 = arith.constant 0 : index
    %c0_4 = arith.constant 0 : index
    %3 = vector.load %arg5[%c0_3, %c0_4] : memref<1x128xf32, #tpu.memory_space<vmem>>, vector<1x128xf32>
    %4 = vector.broadcast %3 : vector<1x128xf32> to vector<8x128xf32>
    %5 = arith.addf %2, %4 : vector<8x128xf32>
    %cst_5 = arith.constant 0.000000e+00 : f32
    %6 = vector.broadcast %cst_5 : f32 to vector<8x128xf32>
    %7 = arith.maximumf %5, %6 : vector<8x128xf32>
    %c0_6 = arith.constant 0 : index
    %c0_7 = arith.constant 0 : index
    %8 = vector.load %arg2[%c0_6, %c0_7] : memref<8x128xi32, #tpu.memory_space<vmem>>, vector<8x128xi32>
    %c-1288490189_i32 = arith.constant -1288490189 : i32
    %9 = vector.broadcast %c-1288490189_i32 : i32 to vector<8x128xi32>
    %10 = arith.cmpi uge, %8, %9 : vector<8x128xi32>
    %cst_8 = arith.constant 0.000000e+00 : f32
    %11 = vector.broadcast %cst_8 : f32 to vector<8x128xf32>
    %12 = arith.select %10, %7, %11 : vector<8x128xi1>, vector<8x128xf32>
    %c0_9 = arith.constant 0 : index
    %c0_10 = arith.constant 0 : index
    %13 = vector.load %arg6[%c0_9, %c0_10] : memref<128x128xf32, #tpu.memory_space<vmem>>, vector<128x128xf32>
    %cst_11 = arith.constant dense<0.000000e+00> : vector<8x128xf32>
    %14 = tpu.matmul %12, %13, %cst_11 {dimension_numbers = #tpu.dot_dimension_numbers<[1], [0], [0], [1], [0, 0, 1, 1], [], []>} : vector<8x128xf32>, vector<128x128xf32>, vector<8x128xf32> -> vector<8x128xf32>
    %c0_12 = arith.constant 0 : index
    %c0_13 = arith.constant 0 : index
    %15 = vector.load %arg7[%c0_12, %c0_13] : memref<1x128xf32, #tpu.memory_space<vmem>>, vector<1x128xf32>
    %16 = vector.broadcast %15 : vector<1x128xf32> to vector<8x128xf32>
    %17 = arith.addf %14, %16 : vector<8x128xf32>
    %cst_14 = arith.constant 0.000000e+00 : f32
    %18 = vector.broadcast %cst_14 : f32 to vector<8x128xf32>
    %19 = arith.maximumf %17, %18 : vector<8x128xf32>
    %c0_15 = arith.constant 0 : index
    %c0_16 = arith.constant 0 : index
    %20 = vector.load %arg3[%c0_15, %c0_16] : memref<8x128xi32, #tpu.memory_space<vmem>>, vector<8x128xi32>
    %c-1288490189_i32_17 = arith.constant -1288490189 : i32
    %21 = vector.broadcast %c-1288490189_i32_17 : i32 to vector<8x128xi32>
    %22 = arith.cmpi uge, %20, %21 : vector<8x128xi32>
    %cst_18 = arith.constant 0.000000e+00 : f32
    %23 = vector.broadcast %cst_18 : f32 to vector<8x128xf32>
    %24 = arith.select %22, %19, %23 : vector<8x128xi1>, vector<8x128xf32>
    %c0_19 = arith.constant 0 : index
    %c0_20 = arith.constant 0 : index
    %25 = vector.load %arg8[%c0_19, %c0_20] : memref<128x128xf32, #tpu.memory_space<vmem>>, vector<128x128xf32>
    %cst_21 = arith.constant dense<0.000000e+00> : vector<8x128xf32>
    %26 = tpu.matmul %24, %25, %cst_21 {dimension_numbers = #tpu.dot_dimension_numbers<[1], [0], [0], [1], [0, 0, 1, 1], [], []>} : vector<8x128xf32>, vector<128x128xf32>, vector<8x128xf32> -> vector<8x128xf32>
    %c0_22 = arith.constant 0 : index
    %c0_23 = arith.constant 0 : index
    %27 = vector.load %arg9[%c0_22, %c0_23] : memref<1x128xf32, #tpu.memory_space<vmem>>, vector<1x128xf32>
    %28 = vector.broadcast %27 : vector<1x128xf32> to vector<8x128xf32>
    %29 = arith.addf %26, %28 : vector<8x128xf32>
    %c0_24 = arith.constant 0 : index
    %c0_25 = arith.constant 0 : index
    %30 = vector.load %arg10[%c0_24, %c0_25] : memref<8x128xf32, #tpu.memory_space<vmem>>, vector<8x128xf32>
    tpu.vector_store %arg10[%c0_24, %c0_25], %29 {strides = array<i32>} : memref<8x128xf32, #tpu.memory_space<vmem>>, vector<8x128xf32>,
    return
  }
  func.func @transform_0(%arg0: i32) -> (i32, i32) {
    %c0_i32 = arith.constant 0 : i32
    %c0_i32_0 = arith.constant 0 : i32
    return %arg0, %c0_i32 : i32, i32
  }
  func.func @transform_1(%arg0: i32) -> (i32, i32) {
    %c0_i32 = arith.constant 0 : i32
    %c0_i32_0 = arith.constant 0 : i32
    return %arg0, %c0_i32 : i32, i32
  }
  func.func @transform_2(%arg0: i32) -> (i32, i32) {
    %c0_i32 = arith.constant 0 : i32
    %c0_i32_0 = arith.constant 0 : i32
    return %arg0, %c0_i32 : i32, i32
  }
  func.func @transform_3(%arg0: i32) -> (i32, i32) {
    %c0_i32 = arith.constant 0 : i32
    %c0_i32_0 = arith.constant 0 : i32
    %c0_i32_1 = arith.constant 0 : i32
    return %c0_i32, %c0_i32_0 : i32, i32
  }
  func.func @transform_4(%arg0: i32) -> (i32, i32) {
    %c0_i32 = arith.constant 0 : i32
    %c0_i32_0 = arith.constant 0 : i32
    %c0_i32_1 = arith.constant 0 : i32
    return %c0_i32, %c0_i32_0 : i32, i32
  }
  func.func @transform_5(%arg0: i32) -> (i32, i32) {
    %c0_i32 = arith.constant 0 : i32
    %c0_i32_0 = arith.constant 0 : i32
    %c0_i32_1 = arith.constant 0 : i32
    return %c0_i32, %c0_i32_0 : i32, i32
  }
  func.func @transform_6(%arg0: i32) -> (i32, i32) {
    %c0_i32 = arith.constant 0 : i32
    %c0_i32_0 = arith.constant 0 : i32
    %c0_i32_1 = arith.constant 0 : i32
    return %c0_i32, %c0_i32_0 : i32, i32
  }
  func.func @transform_7(%arg0: i32) -> (i32, i32) {
    %c0_i32 = arith.constant 0 : i32
    %c0_i32_0 = arith.constant 0 : i32
    %c0_i32_1 = arith.constant 0 : i32
    return %c0_i32, %c0_i32_0 : i32, i32
  }
  func.func @transform_8(%arg0: i32) -> (i32, i32) {
    %c0_i32 = arith.constant 0 : i32
    %c0_i32_0 = arith.constant 0 : i32
    %c0_i32_1 = arith.constant 0 : i32
    return %c0_i32, %c0_i32_0 : i32, i32
  }
  func.func @transform_9(%arg0: i32) -> (i32, i32) {
    %c0_i32 = arith.constant 0 : i32
    %c0_i32_0 = arith.constant 0 : i32
    return %arg0, %c0_i32 : i32, i32
  }
}

</mosaic_0001>

<bundles_post_ra>
// kernel: tpu_custom_call.1
= control target key start
LH: loop header
LB: loop body
LE: loop exit
PB: predicated region body
PF: predicated region fallthrough
CT: control target
= control target key end

     0   :  { %14 = vsyncpa [#allocation3], 0  ;;  %s1027_s0 = inlined_call_operand.hbm [shape: f32[8,256], index: 0, kind: input, shape index: {}]   ;;  %s1028_s1 = inlined_call_operand.hbm [shape: u32[8,128], index: 1, kind: input, shape index: {}]   ;;  %s1029_s2 = inlined_call_operand.hbm [shape: u32[8,128], index: 2, kind: input, shape index: {}]   ;;  %s1030_s3 = inlined_call_operand.hbm [shape: f32[256,128], index: 3, kind: input, shape index: {}]   ;;  %s1031_s4 = inlined_call_operand.vmem [shape: f32[1,128], index: 4, kind: input, shape index: {}]   ;;  %s1032_s5 = inlined_call_operand.hbm [shape: f32[128,128], index: 5, kind: input, shape index: {}]   ;;  %s1033_s6 = inlined_call_operand.vmem [shape: f32[1,128], index: 6, kind: input, shape index: {}]   ;;  %s1034_s7 = inlined_call_operand.hbm [shape: f32[128,128], index: 7, kind: input, shape index: {}]   ;;  %s1035_s8 = inlined_call_operand.vmem [shape: f32[1,128], index: 8, kind: input, shape index: {}]   ;;  %s1036_s9 = inlined_call_operand.hbm [shape: f32[8,128], index: 9, kind: output, shape index: {}]  }
   0x1   :  { %15 = vsyncpa [#allocation6], 0 }
   0x2   :  { %16 = vsyncpa [#allocation9], 0 }
   0x3   :  { %17 = vsyncpa [#allocation12], 0 }
   0x4   :  { %18 = vsyncpa [#allocation4], 0  ;;  %s833_s30 = smov [#allocation5]   ;;  %s834_s11 = smov [#allocation8]  }
   0x5   :  { %s35_s10 = sshll.u32 %s833_s30, 4  ;;  %s54_s12 = sshll.u32 %s834_s11, 4  ;;  %s36_s10 = int_to_ptr.vmem [resolvable:$true] %s35_s10  ;;  %s895_s12 = int_to_ptr.vmem [resolvable:$true] %s54_s12 }
   0x6   :  { %s669_s15 = scalar_lea.hbm %s1028_s1, 128 }
   0x7   :  { %p670_p0 = scmp.ne.s32.totalorder %s1028_s1, %s669_s15  ;;  %p673_p1 = scmp.lt.u32.totalorder %s669_s15, %s1028_s1 }
   0x9   :  { %p675_p2 = pnand %p673_p1, %p670_p0 }
   0xb   :  { %678 = shalt.err (!%p675_p2)
}
   0xc   :  { %s679_s20 = scalar_lea.vmem %s36_s10, 128  ;;  %p684_p4 = scmp.lt.s32.totalorder %s36_s10, %s36_s10 }
   0xd   :  { %p680_p3 = scmp.ne.s32.totalorder %s36_s10, %s679_s20  ;;  %p685_p5 = scmp.lt.s32.totalorder %s679_s20, %s679_s20 }
   0xf   :  { %p686_p6 = por %p685_p5, %p684_p4 }
  0x11   :  { %p687_p7 = pnand %p686_p6, %p680_p3 }
  0x13   :  { %690 = shalt.err (!%p687_p7)
}
  0x14   :  { %38 = dma.hbm_to_vmem [thread:$0]  %s1028_s1, 128, %s36_s10, [#allocation6]  }
  0x15   :  { %s691_s25 = scalar_lea.hbm %s1030_s3, 4096 }
  0x16   :  { %p692_p8 = scmp.ne.s32.totalorder %s1030_s3, %s691_s25  ;;  %p695_p9 = scmp.lt.u32.totalorder %s691_s25, %s1030_s3 }
  0x18   :  { %p697_p10 = pnand %p695_p9, %p692_p8 }
  0x1a   :  { %700 = shalt.err (!%p697_p10)
}
  0x1b   :  { %s701_s30 = scalar_lea.vmem %s895_s12, 4096  ;;  %p706_p12 = scmp.lt.s32.totalorder %s895_s12, %s895_s12 }
  0x1c   :  { %p702_p11 = scmp.ne.s32.totalorder %s895_s12, %s701_s30  ;;  %p707_p13 = scmp.lt.s32.totalorder %s701_s30, %s701_s30 }
  0x1e   :  { %p708_p0 = por %p707_p13, %p706_p12 }
  0x20   :  { %p709_p1 = pnand %p708_p0, %p702_p11 }
  0x22   :  { %712 = shalt.err (!%p709_p1)
}
  0x23   :  { %s835_s1 = smov 128   ;;  %s836_s10 = smov 8  }
  0x24   :  { %60 = dma.hbm_to_vmem [thread:$0]  %s1030_s3, 4096, %s895_s12, [#allocation9], %s835_s1, %s835_s1, %s836_s10  }
  0x25   :  { %s837_s14 = smov [#allocation2]   ;;  %s838_s16 = smov [#allocation7]  }
  0x26   :  { %s25_s15 = sshll.u32 %s837_s14, 4  ;;  %s45_s17 = sshll.u32 %s838_s16, 4  ;;  %s26_s15 = int_to_ptr.vmem [resolvable:$true] %s25_s15  ;;  %s46_s17 = int_to_ptr.vmem [resolvable:$true] %s45_s17 }
  0x27   :  { %s713_s20 = scalar_lea.hbm %s1027_s0, 256 }
  0x28   :  { %p714_p2 = scmp.ne.s32.totalorder %s1027_s0, %s713_s20  ;;  %p717_p3 = scmp.lt.u32.totalorder %s713_s20, %s1027_s0 }
  0x2a   :  { %p719_p4 = pnand %p717_p3, %p714_p2 }
  0x2c   :  { %722 = shalt.err (!%p719_p4)
}
  0x2d   :  { %s723_s3 = scalar_lea.vmem %s26_s15, 256  ;;  %p728_p6 = scmp.lt.s32.totalorder %s26_s15, %s26_s15 }
  0x2e   :  { %p724_p5 = scmp.ne.s32.totalorder %s26_s15, %s723_s3  ;;  %p729_p7 = scmp.lt.s32.totalorder %s723_s3, %s723_s3 }
  0x30   :  { %p730_p8 = por %p729_p7, %p728_p6 }
  0x32   :  { %p731_p9 = pnand %p730_p8, %p724_p5 }
  0x34   :  { %734 = shalt.err (!%p731_p9)
}
  0x35   :  { %28 = dma.hbm_to_vmem [thread:$0]  %s1027_s0, 256, %s26_s15, [#allocation3]  }
  0x36   :  { %s735_s28 = scalar_lea.hbm %s1029_s2, 128 }
  0x37   :  { %p736_p10 = scmp.ne.s32.totalorder %s1029_s2, %s735_s28  ;;  %p739_p11 = scmp.lt.u32.totalorder %s735_s28, %s1029_s2 }
  0x39   :  { %p741_p12 = pnand %p739_p11, %p736_p10 }
  0x3b   :  { %744 = shalt.err (!%p741_p12)
}
  0x3c   :  { %s745_s14 = scalar_lea.vmem %s46_s17, 128  ;;  %p750_p0 = scmp.lt.s32.totalorder %s46_s17, %s46_s17 }
  0x3d   :  { %p746_p13 = scmp.ne.s32.totalorder %s46_s17, %s745_s14  ;;  %p751_p1 = scmp.lt.s32.totalorder %s745_s14, %s745_s14 }
  0x3f   :  { %p752_p2 = por %p751_p1, %p750_p0 }
  0x41   :  { %p753_p3 = pnand %p752_p2, %p746_p13 }
  0x43   :  { %756 = shalt.err (!%p753_p3)
}
  0x44   :  { %48 = dma.hbm_to_vmem [thread:$0]  %s1029_s2, 128, %s46_s17, [#allocation6]  }
  0x45   :  { %s839_s16 = smov [#allocation10]   ;;  %s840_s19 = smov [#allocation11]  }
  0x46   :  { %s68_s18 = sshll.u32 %s839_s16, 4  ;;  %s82_s20 = sshll.u32 %s840_s19, 4  ;;  %s69_s18 = int_to_ptr.vmem [resolvable:$true] %s68_s18  ;;  %s953_s20 = int_to_ptr.vmem [resolvable:$true] %s82_s20 }
  0x47   :  { %s757_s23 = scalar_lea.hbm %s1032_s5, 2048 }
  0x48   :  { %p758_p4 = scmp.ne.s32.totalorder %s1032_s5, %s757_s23  ;;  %p761_p5 = scmp.lt.u32.totalorder %s757_s23, %s1032_s5 }
  0x4a   :  { %p763_p6 = pnand %p761_p5, %p758_p4 }
  0x4c   :  { %766 = shalt.err (!%p763_p6)
}
  0x4d   :  { %s767_s2 = scalar_lea.vmem %s69_s18, 2048  ;;  %p772_p8 = scmp.lt.s32.totalorder %s69_s18, %s69_s18 }
  0x4e   :  { %p768_p7 = scmp.ne.s32.totalorder %s69_s18, %s767_s2  ;;  %p773_p9 = scmp.lt.s32.totalorder %s767_s2, %s767_s2 }
  0x50   :  { %p774_p10 = por %p773_p9, %p772_p8 }
  0x52   :  { %p775_p11 = pnand %p774_p10, %p768_p7 }
  0x54   :  { %778 = shalt.err (!%p775_p11)
}
  0x55   :  { %74 = dma.hbm_to_vmem [thread:$0]  %s1032_s5, 2048, %s69_s18, [#allocation9], %s835_s1, %s835_s1, %s836_s10  }
  0x56   :  { %s779_s29 = scalar_lea.hbm %s1034_s7, 2048 }
  0x57   :  { %p780_p12 = scmp.ne.s32.totalorder %s1034_s7, %s779_s29  ;;  %p783_p13 = scmp.lt.u32.totalorder %s779_s29, %s1034_s7 }
  0x59   :  { %p785_p0 = pnand %p783_p13, %p780_p12 }
  0x5b   :  { %788 = shalt.err (!%p785_p0)
}
  0x5c   :  { %s789_s0 = scalar_lea.vmem %s953_s20, 2048  ;;  %p794_p2 = scmp.lt.s32.totalorder %s953_s20, %s953_s20 }
  0x5d   :  { %p790_p1 = scmp.ne.s32.totalorder %s953_s20, %s789_s0  ;;  %p795_p3 = scmp.lt.s32.totalorder %s789_s0, %s789_s0 }
  0x5f   :  { %p796_p4 = por %p795_p3, %p794_p2 }
  0x61   :  { %p797_p5 = pnand %p796_p4, %p790_p1 }
  0x63   :  { %800 = shalt.err (!%p797_p5)
}
  0x64   :  { %88 = dma.hbm_to_vmem [thread:$0]  %s1034_s7, 2048, %s953_s20, [#allocation12], %s835_s1, %s835_s1, %s836_s10  }
  0x65   :  { %823 = dma.done.wait [#allocation3], 256  }
  0x66   :  { %824 = vsyncadd [#allocation3], 4294967040 }
  0x67   :  { %825 = dma.done.wait [#allocation6], 256  }
  0x68   :  { %826 = vsyncadd [#allocation6], 4294967040 }
  0x69   :  { %827 = dma.done.wait [#allocation9], 6144  }
  0x6a   :  { %828 = vsyncadd [#allocation9], 4294961152 }
  0x6b   :  { %829 = dma.done.wait [#allocation12], 2048  }
  0x6c   :  { %830 = vsyncadd [#allocation12], 4294965248  ;;  %v841_v0 = vmov 0.0|0.0   ;;  %v127_v1 = vld [vmem:[#allocation8 + $0x80] sm:$0xff]  ;;  %v128_v2 = vld [vmem:[#allocation8 + $0x88] sm:$0xff]  ;;  %vm842_vm0 = vmmov 0  }
  0x6d   :  { %609 = vmatprep.subr.bf16.mxu1 %v841_v0  ;;  %v111_v3 = vld [vmem:[#allocation8] sm:$0xff]  ;;  %v577_v4 = vpack.c.bf16 %v128_v2, %v127_v1  ;;  %v112_v5 = vld [vmem:[#allocation8 + $0x8] sm:$0xff]  ;;  %v129_v6 = vld [vmem:[#allocation8 + $0x90] sm:$0xff]  ;;  %s844_s19 = smov [#allocation13]  }
  0x6e   :  { %v130_v7 = vld [vmem:[#allocation8 + $0x98] sm:$0xff]  ;;  %v579_v8 = vpack.c.bf16 %v112_v5, %v111_v3  ;;  %v113_v10 = vld [vmem:[#allocation8 + $0x10] sm:$0xff]  ;;  %v131_v12 = vld [vmem:[#allocation8 + $0xa0] sm:$0xff]  ;;  %s421_s20 = sshll.u32 %s844_s19, 4  ;;  %s422_s20 = int_to_ptr.vmem [resolvable:$true] %s421_s20 }
  0x6f   :  { %v581_v9 = vpack.c.bf16 %v130_v7, %v129_v6  ;;  %v114_v11 = vld [vmem:[#allocation8 + $0x18] sm:$0xff]  ;;  %578 = vmatprep.subr.bf16.mxu0 %v577_v4  ;;  %v132_v13 = vld [vmem:[#allocation8 + $0xa8] sm:$0xff]  ;;  %v115_v16 = vld [vmem:[#allocation8 + $0x20] sm:$0xff]  ;;  %s801_s21 = scalar_lea.vmem %s422_s20, 128  ;;  %p806_p7 = scmp.lt.s32.totalorder %s422_s20, %s422_s20 }
  0x70   :  { %580 = vmatpush3.bf16.msra.mxu0 %v579_v8  ;;  %v583_v14 = vpack.c.bf16 %v114_v11, %v113_v10  ;;  %v585_v15 = vpack.c.bf16 %v132_v13, %v131_v12  ;;  %v116_v17 = vld [vmem:[#allocation8 + $0x28] sm:$0xff]  ;;  %v133_v18 = vld [vmem:[#allocation8 + $0xb0] sm:$0xff]  ;;  %v134_v19 = vld [vmem:[#allocation8 + $0xb8] sm:$0xff]  ;;  %v843_v12 = vmov 0.0   ;;  %p802_p6 = scmp.ne.s32.totalorder %s422_s20, %s801_s21  ;;  %p807_p8 = scmp.lt.s32.totalorder %s801_s21, %s801_s21 }
  0x71   :  { %582 = vmatprep.subr.bf16.mxu0 %v581_v9  ;;  %v587_v20 = vpack.c.bf16 %v116_v17, %v115_v16  ;;  %v589_v21 = vpack.c.bf16 %v134_v19, %v133_v18  ;;  %v117_v22 = vld [vmem:[#allocation8 + $0x30] sm:$0xff]  ;;  %v118_v23 = vld [vmem:[#allocation8 + $0x38] sm:$0xff]  ;;  %v135_v24 = vld [vmem:[#allocation8 + $0xc0] sm:$0xff]  ;;  %539 = vmatprep.mubr.msk.f32.mxu1 %vm842_vm0, %v843_v12 }
  0x72   :  { %v136_v25 = vld [vmem:[#allocation8 + $0xc8] sm:$0xff]  ;;  %v224_v27 = vld [vmem:[#allocation10] sm:$0xff]  ;;  %v591_v29 = vpack.c.bf16 %v118_v23, %v117_v22  ;;  %v226_v31 = vld [vmem:[#allocation10 + $0x10] sm:$0xff]  ;;  %p808_p9 = por %p807_p8, %p806_p7 }
  0x73   :  { %v110_v26 = vld [vmem:[#allocation2 + $0x8] sm:$0xff]  ;;  %v227_v32 = vld [vmem:[#allocation10 + $0x18] sm:$0xff]  ;;  %v593_v33 = vpack.c.bf16 %v136_v25, %v135_v24  ;;  %v119_v34 = vld [vmem:[#allocation8 + $0x40] sm:$0xff] }
  0x74   :  { %584 = vmatpush3.bf16.msra.mxu0 %v583_v14  ;;  %214 = vmatprep.mubr.f32.mxu0 %v110_v26  ;;  %v225_v28 = vld [vmem:[#allocation10 + $0x8] sm:$0xff]  ;;  %v137_v36 = vld [vmem:[#allocation8 + $0xd0] sm:$0xff]  ;;  %v138_v37 = vld [vmem:[#allocation8 + $0xd8] sm:$0xff]  ;;  %v613_v38 = vpack.c.bf16 %v227_v32, %v226_v31  ;;  %p809_p10 = pnand %p808_p9, %p802_p6 }
  0x75   :  { %586 = vmatprep.subr.bf16.mxu0 %v585_v15  ;;  %v610_v30 = vpack.c.bf16 %v225_v28, %v224_v27  ;;  %v120_v35 = vld [vmem:[#allocation8 + $0x48] sm:$0xff]  ;;  %v228_v39 = vld [vmem:[#allocation10 + $0x20] sm:$0xff]  ;;  %v597_v42 = vpack.c.bf16 %v138_v37, %v137_v36  ;;  %v121_v43 = vld [vmem:[#allocation8 + $0x50] sm:$0xff] }
  0x76   :  { %v229_v40 = vld [vmem:[#allocation10 + $0x28] sm:$0xff]  ;;  %v595_v41 = vpack.c.bf16 %v120_v35, %v119_v34  ;;  %v122_v44 = vld [vmem:[#allocation8 + $0x58] sm:$0xff]  ;;  %v139_v45 = vld [vmem:[#allocation8 + $0xe0] sm:$0xff] }
  0x77   :  { %611 = vmatpush3.bf16.msra.mxu1 %v610_v30  ;;  %v140_v46 = vld [vmem:[#allocation8 + $0xe8] sm:$0xff]  ;;  %v616_v47 = vpack.c.bf16 %v229_v40, %v228_v39  ;;  %v230_v48 = vld [vmem:[#allocation10 + $0x30] sm:$0xff]  ;;  %v231_v49 = vld [vmem:[#allocation10 + $0x38] sm:$0xff]  ;;  %v599_v50 = vpack.c.bf16 %v122_v44, %v121_v43 }
  0x78   :  { %588 = vmatpush3.bf16.msra.mxu0 %v587_v20  ;;  %612 = vmatprep.subr.bf16.mxu1 %v841_v0  ;;  %v601_v51 = vpack.c.bf16 %v140_v46, %v139_v45  ;;  %v123_v52 = vld [vmem:[#allocation8 + $0x60] sm:$0xff]  ;;  %v124_v53 = vld [vmem:[#allocation8 + $0x68] sm:$0xff]  ;;  %v141_v54 = vld [vmem:[#allocation8 + $0xf0] sm:$0xff]  ;;  %v619_v56 = vpack.c.bf16 %v231_v49, %v230_v48 }
  0x79   :  { %590 = vmatprep.subr.bf16.mxu0 %v589_v21  ;;  %v142_v55 = vld [vmem:[#allocation8 + $0xf8] sm:$0xff]  ;;  %v232_v57 = vld [vmem:[#allocation10 + $0x40] sm:$0xff]  ;;  %v233_v58 = vld [vmem:[#allocation10 + $0x48] sm:$0xff]  ;;  %v603_v59 = vpack.c.bf16 %v124_v53, %v123_v52 }
  0x7a   :  { %v605_v60 = vpack.c.bf16 %v142_v55, %v141_v54  ;;  %v125_v61 = vld [vmem:[#allocation8 + $0x70] sm:$0xff]  ;;  %v126_v62 = vld [vmem:[#allocation8 + $0x78] sm:$0xff]  ;;  %v622_v63 = vpack.c.bf16 %v233_v58, %v232_v57  ;;  %v109_v5 = vld [vmem:[#allocation2] sm:$0xff] }
  0x7b   :  { %614 = vmatpush3.bf16.msra.mxu1 %v613_v38  ;;  %v234_v1 = vld [vmem:[#allocation10 + $0x50] sm:$0xff]  ;;  %v235_v2 = vld [vmem:[#allocation10 + $0x58] sm:$0xff]  ;;  %v607_v3 = vpack.c.bf16 %v126_v62, %v125_v61  ;;  %v236_v6 = vld [vmem:[#allocation10 + $0x60] sm:$0xff] }
  0x7c   :  { %592 = vmatpush3.bf16.msra.mxu0 %v591_v29  ;;  %615 = vmatprep.subr.bf16.mxu1 %v841_v0  ;;  %v625_v4 = vpack.c.bf16 %v235_v2, %v234_v1  ;;  %v237_v7 = vld [vmem:[#allocation10 + $0x68] sm:$0xff]  ;;  %v238_v9 = vld [vmem:[#allocation10 + $0x70] sm:$0xff]  ;;  %v239_v10 = vld [vmem:[#allocation10 + $0x78] sm:$0xff] }
  0x7d   :  { %594 = vmatprep.subr.bf16.mxu0 %v593_v33  ;;  %v628_v8 = vpack.c.bf16 %v237_v7, %v236_v6  ;;  %v631_v11 = vpack.c.bf16 %v239_v10, %v238_v9  ;;  %v321_v13 = vld [vmem:[#allocation11] sm:$0xff]  ;;  %v322_v14 = vld [vmem:[#allocation11 + $0x8] sm:$0xff]  ;;  %v323_v15 = vld [vmem:[#allocation11 + $0x10] sm:$0xff] }
  0x7e   :  { %v634_v16 = vpack.c.bf16 %v322_v14, %v321_v13  ;;  %v324_v17 = vld [vmem:[#allocation11 + $0x18] sm:$0xff]  ;;  %v325_v19 = vld [vmem:[#allocation11 + $0x20] sm:$0xff]  ;;  %v326_v20 = vld [vmem:[#allocation11 + $0x28] sm:$0xff] }
  0x7f   :  { %617 = vmatpush3.bf16.msra.mxu1 %v616_v47  ;;  %v637_v18 = vpack.c.bf16 %v324_v17, %v323_v15  ;;  %v640_v21 = vpack.c.bf16 %v326_v20, %v325_v19  ;;  %v327_v22 = vld [vmem:[#allocation11 + $0x30] sm:$0xff]  ;;  %v328_v23 = vld [vmem:[#allocation11 + $0x38] sm:$0xff]  ;;  %v329_v25 = vld [vmem:[#allocation11 + $0x40] sm:$0xff] }
  0x80   :  { %596 = vmatpush3.bf16.msra.mxu0 %v595_v41  ;;  %618 = vmatprep.subr.bf16.mxu1 %v841_v0  ;;  %v643_v24 = vpack.c.bf16 %v328_v23, %v327_v22  ;;  %v330_v26 = vld [vmem:[#allocation11 + $0x48] sm:$0xff]  ;;  %v331_v28 = vld [vmem:[#allocation11 + $0x50] sm:$0xff]  ;;  %v332_v29 = vld [vmem:[#allocation11 + $0x58] sm:$0xff] }
  0x81   :  { %598 = vmatprep.subr.bf16.mxu0 %v597_v42  ;;  %v646_v27 = vpack.c.bf16 %v330_v26, %v329_v25  ;;  %v649_v30 = vpack.c.bf16 %v332_v29, %v331_v28  ;;  %v333_v31 = vld [vmem:[#allocation11 + $0x60] sm:$0xff]  ;;  %v334_v32 = vld [vmem:[#allocation11 + $0x68] sm:$0xff]  ;;  %v221_v38 = vld [vmem:[#allocation5] sm:$0xff] }
  0x82   :  { %v652_v33 = vpack.c.bf16 %v334_v32, %v333_v31  ;;  %v433_v35 = vld [vmem:[%s1031_s4] ss:$0 sm:$0xff]  ;;  %vm222_vm1 = vcmp.ge.u32.totalorder %v221_v38, 3006477107  ;;  %v335_v41 = vld [vmem:[#allocation11 + $0x70] sm:$0xff]  ;;  %v336_v42 = vld [vmem:[#allocation11 + $0x78] sm:$0xff] }
  0x83   :  { %620 = vmatpush3.bf16.msra.mxu1 %v619_v56  ;;  %v655_v43 = vpack.c.bf16 %v336_v42, %v335_v41  ;;  %v318_v44 = vld [vmem:[#allocation7] sm:$0xff]  ;;  %v436_v49 = vld [vmem:[%s1035_s8] ss:$0 sm:$0xff] }
  0x84   :  { %600 = vmatpush3.bf16.msra.mxu0 %v599_v50  ;;  %621 = vmatprep.subr.bf16.mxu1 %v841_v0  ;;  %vm319_vm2 = vcmp.ge.u32.totalorder %v318_v44, 3006477107 }
  0x85   :  { %602 = vmatprep.subr.bf16.mxu0 %v601_v51 }
  0x87   :  { %623 = vmatpush3.bf16.msra.mxu1 %v622_v63 }
  0x88   :  { %604 = vmatpush3.bf16.msra.mxu0 %v603_v59  ;;  %624 = vmatprep.subr.bf16.mxu1 %v841_v0 }
  0x89   :  { %606 = vmatprep.subr.bf16.mxu0 %v605_v60 }
  0x8b   :  { %626 = vmatpush3.bf16.msra.mxu1 %v625_v4 }
  0x8c   :  { %608 = vmatpush3.bf16.msra.mxu0 %v607_v3  ;;  %627 = vmatprep.subr.bf16.mxu1 %v841_v0 }
  0x8d   :  { %633 = vmatprep.subr.bf16.mxu0 %v841_v0 }
  0x8f   :  { %215 = vmatmul.mubr.f32.vlgmr.msra.gmra.mrb[0].mxu0 %v109_v5  ;;  %629 = vmatpush3.bf16.msra.mxu1 %v628_v8 }
  0x90   :  { %630 = vmatprep.subr.bf16.mxu1 %v841_v0  ;;  %574 = vmatprep.mubr.msk.f32.mxu0 %vm842_vm0, %v843_v12 }
  0x91   :  { %635 = vmatpush3.bf16.msra.mxu0 %v634_v16 }
  0x92   :  { %636 = vmatprep.subr.bf16.mxu0 %v841_v0 }
  0x93   :  { %632 = vmatpush3.bf16.msra.mxu1 %v631_v11 }
  0x95   :  { %638 = vmatpush3.bf16.msra.mxu0 %v637_v18 }
  0x96   :  { %639 = vmatprep.subr.bf16.mxu0 %v841_v0 }
  0x99   :  { %641 = vmatpush3.bf16.msra.mxu0 %v640_v21 }
  0x9a   :  { %642 = vmatprep.subr.bf16.mxu0 %v841_v0 }
  0x9d   :  { %644 = vmatpush3.bf16.msra.mxu0 %v643_v24 }
  0x9e   :  { %645 = vmatprep.subr.bf16.mxu0 %v841_v0 }
  0xa1   :  { %647 = vmatpush3.bf16.msra.mxu0 %v646_v27 }
  0xa2   :  { %648 = vmatprep.subr.bf16.mxu0 %v841_v0 }
  0xa5   :  { %650 = vmatpush3.bf16.msra.mxu0 %v649_v30 }
  0xa6   :  { %651 = vmatprep.subr.bf16.mxu0 %v841_v0 }
  0xa9   :  { %653 = vmatpush3.bf16.msra.mxu0 %v652_v33 }
  0xaa   :  { %654 = vmatprep.subr.bf16.mxu0 %v841_v0  ;;  %v434_v0 = vld [vmem:[%s1033_s6] ss:$0 sm:$0xff] }
  0xad   :  { %656 = vmatpush3.bf16.msra.mxu0 %v655_v43 }
 0x162   :  { %v470_v34 = vpop.f32.mrb[0].mxu0 }
 0x163   :  { %v471_v36 = vpop.f32.mrb[1].mxu0 }
 0x164   :  { %v472_v37 = vadd.f32 %v471_v36, %v470_v34 }
 0x166   :  { %v217_v39 = vadd.f32 %v472_v37, %v433_v35 }
 0x168   :  { %v220_v40 = vmax.f32 %v217_v39, 0.0 }
 0x16a   :  { %540 = vmatmul.mubr.msk.f32.vlgmr.msra.gmra.mrb[0].mxu1 %vm222_vm1, %v220_v40 }
 0x23d   :  { %v313_v45 = vpop.f32.mrb[0].mxu1 }
 0x23e   :  { %v314_v46 = vadd.f32 %v434_v0, %v313_v45  ;;  %v541_v47 = vpop.f32.mrb[1].mxu1 }
 0x240   :  { %v317_v48 = vmax.f32 %v314_v46, 0.0 }
 0x242   :  { %575 = vmatmul.mubr.msk.f32.vlgmr.msra.gmra.mrb[2].mxu0 %vm319_vm2, %v317_v48 }
 0x315   :  { %v410_v50 = vpop.f32.mrb[2].mxu0 }
 0x316   :  { %v411_v51 = vadd.f32 %v436_v49, %v410_v50  ;;  %v576_v52 = vpop.f32.mrb[3].mxu0 }
 0x318   :  { %414 = vst [vmem:[#allocation13] sm:$0xff] %v411_v51 }
 0x319   :  { %812 = shalt.err (!%p809_p10)
}
 0x31a   :  { %s813_s23 = scalar_lea.hbm %s1036_s9, 128 }
 0x31b   :  { %p814_p11 = scmp.ne.s32.totalorder %s1036_s9, %s813_s23  ;;  %p817_p12 = scmp.lt.u32.totalorder %s813_s23, %s1036_s9 }
 0x31d   :  { %p819_p13 = pnand %p817_p12, %p814_p11 }
 0x31f   :  { %822 = shalt.err (!%p819_p13)
}
 0x320   :  { %424 = dma.vmem_to_hbm [thread:$0]  %s422_s20, 128, %s1036_s9, [#allocation4]  }
 0x321   :  { %831 = dma.done.wait [#allocation4], 128  }
 0x322   :  { %832 = vsyncadd [#allocation4], 4294967168 }
 0x323   :  { %428 = vsyncpa [#allocation3], 1 }
 0x324   :  { %429 = vsyncpa [#allocation6], 1 }
 0x325   :  { %430 = vsyncpa [#allocation9], 1 }
 0x326   :  { %431 = vsyncpa [#allocation12], 1 }
 0x327   :  { %432 = vsyncpa [#allocation4], 1 }

</bundles_post_ra>
